<compile_context>
chip_gen: v5e
topology: v5e:2x2
jax: 0.10.0
libtpu: 0.0.40
codegen_flags: <defaults>
</compile_context>

<pallas_src>
import jax
import jax.numpy as jnp
from jax.experimental import pallas as pl
from jax.experimental.pallas import tpu as pltpu  # noqa: F401  (kept for TPU backend)

HIDDEN = 8      # hidden_channels
FEATS = 4       # number_of_features
CLASSES = 3     # number_of_classes
N_NODES = 16
N_GRAPHS = 2


# ---------------------------------------------------------------------------
# Single fused kernel: conv1..conv3 (+ReLU) -> global_mean_pool -> Linear
# ---------------------------------------------------------------------------
def _gcne_kernel(x_ref, adj_ref, pool_ref,
                 w1r_ref, w1s_ref, b1_ref,
                 w2r_ref, w2s_ref, b2_ref,
                 w3r_ref, w3s_ref, b3_ref,
                 linw_ref, linb_ref,
                 o_ref):
    f32 = jnp.float32
    x = x_ref[...]            # [N, F]
    adj = adj_ref[...]        # [N, N]  adj[i, j] = edge weight of edge j -> i

    def graph_conv_relu(h, wr_ref, ws_ref, b_ref):
        # aggregated (weighted-sum) neighbor messages
        agg = jnp.dot(adj, h, preferred_element_type=f32)
        out = (jnp.dot(agg, wr_ref[...], preferred_element_type=f32)   # lin_rel
               + jnp.dot(h, ws_ref[...], preferred_element_type=f32)   # lin_root (no bias)
               + b_ref[...])                                            # lin_rel bias
        return jnp.maximum(out, 0.0)                                    # ReLU

    h = graph_conv_relu(x, w1r_ref, w1s_ref, b1_ref)   # [N, HIDDEN]
    h = graph_conv_relu(h, w2r_ref, w2s_ref, b2_ref)   # [N, HIDDEN]
    h = graph_conv_relu(h, w3r_ref, w3s_ref, b3_ref)   # [N, HIDDEN]

    # global_mean_pool as a precomputed normalized assignment matmul
    pooled = jnp.dot(pool_ref[...], h, preferred_element_type=f32)      # [G, HIDDEN]

    # TODO(synk): F.dropout(p=0.5) is identity in eval mode (not emitted).

    # final Linear
    o_ref[...] = (jnp.dot(pooled, linw_ref[...], preferred_element_type=f32)
                  + linb_ref[...])                                       # [G, CLASSES]


def gcne_forward(params, x, adj, pool_mat):
    n_graphs = pool_mat.shape[0]
    return pl.pallas_call(
        _gcne_kernel,
        out_shape=jax.ShapeDtypeStruct((n_graphs, CLASSES), jnp.float32),
        # No grid / BlockSpecs: every operand is a whole-array VMEM block
        # (total live data << VMEM on v5e/v6e/v7x).
    )(x, adj, pool_mat,
      params["w1_rel"], params["w1_root"], params["b1"],
      params["w2_rel"], params["w2_root"], params["b2"],
      params["w3_rel"], params["w3_root"], params["b3"],
      params["lin_W"], params["lin_b"])


# ---------------------------------------------------------------------------
# Pure-JAX reference (same math) for a correctness check
# ---------------------------------------------------------------------------
def gcne_reference(params, x, adj, pool_mat):
    h = x
    for i in (1, 2, 3):
        agg = adj @ h
        h = jnp.maximum(agg @ params[f"w{i}_rel"]
                        + h @ params[f"w{i}_root"]
                        + params[f"b{i}"], 0.0)
    pooled = pool_mat @ h
    return pooled @ params["lin_W"] + params["lin_b"]


def init_params(key):
    ks = jax.random.split(key, 11)
    def rnd(k, shape, s=0.1):
        return (jax.random.normal(k, shape, jnp.float32) * s)
    return {
        # GraphConv(FEATS -> HIDDEN): lin_rel (with bias), lin_root (no bias)
        "w1_rel":  rnd(ks[0], (FEATS, HIDDEN)),
        "w1_root": rnd(ks[1], (FEATS, HIDDEN)),
        "b1":      rnd(ks[2], (1, HIDDEN), 0.01),
        # GraphConv(HIDDEN -> HIDDEN)
        "w2_rel":  rnd(ks[3], (HIDDEN, HIDDEN)),
        "w2_root": rnd(ks[4], (HIDDEN, HIDDEN)),
        "b2":      rnd(ks[5], (1, HIDDEN), 0.01),
        # GraphConv(HIDDEN -> HIDDEN)
        "w3_rel":  rnd(ks[6], (HIDDEN, HIDDEN)),
        "w3_root": rnd(ks[7], (HIDDEN, HIDDEN)),
        "b3":      rnd(ks[8], (1, HIDDEN), 0.01),
        # Linear(HIDDEN -> CLASSES), stored pre-transposed as [HIDDEN, CLASSES]
        "lin_W":   rnd(ks[9], (HIDDEN, CLASSES)),
        "lin_b":   rnd(ks[10], (1, CLASSES), 0.01),
    }


if __name__ == "__main__":
    key = jax.random.PRNGKey(0)
    kx, kw, kp = jax.random.split(key, 3)

    # Node features: [N, F]
    x = jax.random.normal(kx, (N_NODES, FEATS), jnp.float32)

    # Deterministic edge_index: bidirectional ring within each of 2 graphs of 8 nodes.
    nodes_per_graph = N_NODES // N_GRAPHS
    src, dst = [], []
    for g in range(N_GRAPHS):
        base = g * nodes_per_graph
        for i in range(nodes_per_graph):
            j = (i + 1) % nodes_per_graph
            src += [base + i, base + j]
            dst += [base + j, base + i]
    edge_index = jnp.array([src, dst], dtype=jnp.int32)          # [2, E], E = 32
    n_edges = edge_index.shape[1]

    # Per-edge scalar weights (edge_attr), as GraphConv expects
    edge_attr = 0.5 + jax.random.uniform(kw, (n_edges,), jnp.float32)

    # Graph assignment
    batch = jnp.array([g for g in range(N_GRAPHS) for _ in range(nodes_per_graph)],
                      dtype=jnp.int32)                           # [N]

    # Dense weighted adjacency: adj[dst, src] = edge weight (GraphConv adds NO self loops)
    adj = jnp.zeros((N_NODES, N_NODES), jnp.float32)
    adj = adj.at[edge_index[1], edge_index[0]].add(edge_attr)

    # global_mean_pool as a normalized one-hot assignment matrix [G, N]
    onehot = (batch[None, :] == jnp.arange(N_GRAPHS)[:, None]).astype(jnp.float32)
    pool_mat = onehot / jnp.sum(onehot, axis=1, keepdims=True)

    params = init_params(kp)

    out = gcne_forward(params, x, adj, pool_mat)
    out = jax.block_until_ready(out)

    ref = gcne_reference(params, x, adj, pool_mat)

    assert out.shape == (N_GRAPHS, CLASSES)
    assert bool(jnp.all(jnp.isfinite(out)))
    assert bool(jnp.allclose(out, ref, rtol=1e-5, atol=1e-5))
    print("KERNEL_OK")
</pallas_src>

<mosaic_0001>
module attributes {stable_mosaic.version = 11 : i64} {
  func.func @_gcne_kernel(%arg0: memref<16x4xf32, #tpu.memory_space<vmem>>, %arg1: memref<16x16xf32, #tpu.memory_space<vmem>>, %arg2: memref<2x16xf32, #tpu.memory_space<vmem>>, %arg3: memref<4x8xf32, #tpu.memory_space<vmem>>, %arg4: memref<4x8xf32, #tpu.memory_space<vmem>>, %arg5: memref<1x8xf32, #tpu.memory_space<vmem>>, %arg6: memref<8x8xf32, #tpu.memory_space<vmem>>, %arg7: memref<8x8xf32, #tpu.memory_space<vmem>>, %arg8: memref<1x8xf32, #tpu.memory_space<vmem>>, %arg9: memref<8x8xf32, #tpu.memory_space<vmem>>, %arg10: memref<8x8xf32, #tpu.memory_space<vmem>>, %arg11: memref<1x8xf32, #tpu.memory_space<vmem>>, %arg12: memref<8x3xf32, #tpu.memory_space<vmem>>, %arg13: memref<1x3xf32, #tpu.memory_space<vmem>>, %arg14: memref<2x3xf32, #tpu.memory_space<vmem>>) attributes {dimension_semantics = [], scalar_prefetch = 0 : i64, scratch_operands = 0 : i64, tpu.core_type = #tpu.core_type<tc>} {
    %c0 = arith.constant 0 : index
    %c0_0 = arith.constant 0 : index
    %0 = vector.load %arg0[%c0, %c0_0] : memref<16x4xf32, #tpu.memory_space<vmem>>, vector<16x4xf32>
    %c0_1 = arith.constant 0 : index
    %c0_2 = arith.constant 0 : index
    %1 = vector.load %arg1[%c0_1, %c0_2] : memref<16x16xf32, #tpu.memory_space<vmem>>, vector<16x16xf32>
    %cst = arith.constant dense<0.000000e+00> : vector<16x4xf32>
    %2 = tpu.matmul %1, %0, %cst {dimension_numbers = #tpu.dot_dimension_numbers<[1], [0], [0], [1], [0, 0, 1, 1], [], []>} : vector<16x16xf32>, vector<16x4xf32>, vector<16x4xf32> -> vector<16x4xf32>
    %c0_3 = arith.constant 0 : index
    %c0_4 = arith.constant 0 : index
    %3 = vector.load %arg3[%c0_3, %c0_4] : memref<4x8xf32, #tpu.memory_space<vmem>>, vector<4x8xf32>
    %cst_5 = arith.constant dense<0.000000e+00> : vector<16x8xf32>
    %4 = tpu.matmul %2, %3, %cst_5 {dimension_numbers = #tpu.dot_dimension_numbers<[1], [0], [0], [1], [0, 0, 1, 1], [], []>} : vector<16x4xf32>, vector<4x8xf32>, vector<16x8xf32> -> vector<16x8xf32>
    %c0_6 = arith.constant 0 : index
    %c0_7 = arith.constant 0 : index
    %5 = vector.load %arg4[%c0_6, %c0_7] : memref<4x8xf32, #tpu.memory_space<vmem>>, vector<4x8xf32>
    %cst_8 = arith.constant dense<0.000000e+00> : vector<16x8xf32>
    %6 = tpu.matmul %0, %5, %cst_8 {dimension_numbers = #tpu.dot_dimension_numbers<[1], [0], [0], [1], [0, 0, 1, 1], [], []>} : vector<16x4xf32>, vector<4x8xf32>, vector<16x8xf32> -> vector<16x8xf32>
    %7 = arith.addf %4, %6 : vector<16x8xf32>
    %c0_9 = arith.constant 0 : index
    %c0_10 = arith.constant 0 : index
    %8 = vector.load %arg5[%c0_9, %c0_10] : memref<1x8xf32, #tpu.memory_space<vmem>>, vector<1x8xf32>
    %9 = vector.broadcast %8 : vector<1x8xf32> to vector<16x8xf32>
    %10 = arith.addf %7, %9 : vector<16x8xf32>
    %cst_11 = arith.constant 0.000000e+00 : f32
    %11 = vector.broadcast %cst_11 : f32 to vector<16x8xf32>
    %12 = arith.maximumf %10, %11 : vector<16x8xf32>
    %cst_12 = arith.constant dense<0.000000e+00> : vector<16x8xf32>
    %13 = tpu.matmul %1, %12, %cst_12 {dimension_numbers = #tpu.dot_dimension_numbers<[1], [0], [0], [1], [0, 0, 1, 1], [], []>} : vector<16x16xf32>, vector<16x8xf32>, vector<16x8xf32> -> vector<16x8xf32>
    %c0_13 = arith.constant 0 : index
    %c0_14 = arith.constant 0 : index
    %14 = vector.load %arg6[%c0_13, %c0_14] : memref<8x8xf32, #tpu.memory_space<vmem>>, vector<8x8xf32>
    %cst_15 = arith.constant dense<0.000000e+00> : vector<16x8xf32>
    %15 = tpu.matmul %13, %14, %cst_15 {dimension_numbers = #tpu.dot_dimension_numbers<[1], [0], [0], [1], [0, 0, 1, 1], [], []>} : vector<16x8xf32>, vector<8x8xf32>, vector<16x8xf32> -> vector<16x8xf32>
    %c0_16 = arith.constant 0 : index
    %c0_17 = arith.constant 0 : index
    %16 = vector.load %arg7[%c0_16, %c0_17] : memref<8x8xf32, #tpu.memory_space<vmem>>, vector<8x8xf32>
    %cst_18 = arith.constant dense<0.000000e+00> : vector<16x8xf32>
    %17 = tpu.matmul %12, %16, %cst_18 {dimension_numbers = #tpu.dot_dimension_numbers<[1], [0], [0], [1], [0, 0, 1, 1], [], []>} : vector<16x8xf32>, vector<8x8xf32>, vector<16x8xf32> -> vector<16x8xf32>
    %18 = arith.addf %15, %17 : vector<16x8xf32>
    %c0_19 = arith.constant 0 : index
    %c0_20 = arith.constant 0 : index
    %19 = vector.load %arg8[%c0_19, %c0_20] : memref<1x8xf32, #tpu.memory_space<vmem>>, vector<1x8xf32>
    %20 = vector.broadcast %19 : vector<1x8xf32> to vector<16x8xf32>
    %21 = arith.addf %18, %20 : vector<16x8xf32>
    %cst_21 = arith.constant 0.000000e+00 : f32
    %22 = vector.broadcast %cst_21 : f32 to vector<16x8xf32>
    %23 = arith.maximumf %21, %22 : vector<16x8xf32>
    %cst_22 = arith.constant dense<0.000000e+00> : vector<16x8xf32>
    %24 = tpu.matmul %1, %23, %cst_22 {dimension_numbers = #tpu.dot_dimension_numbers<[1], [0], [0], [1], [0, 0, 1, 1], [], []>} : vector<16x16xf32>, vector<16x8xf32>, vector<16x8xf32> -> vector<16x8xf32>
    %c0_23 = arith.constant 0 : index
    %c0_24 = arith.constant 0 : index
    %25 = vector.load %arg9[%c0_23, %c0_24] : memref<8x8xf32, #tpu.memory_space<vmem>>, vector<8x8xf32>
    %cst_25 = arith.constant dense<0.000000e+00> : vector<16x8xf32>
    %26 = tpu.matmul %24, %25, %cst_25 {dimension_numbers = #tpu.dot_dimension_numbers<[1], [0], [0], [1], [0, 0, 1, 1], [], []>} : vector<16x8xf32>, vector<8x8xf32>, vector<16x8xf32> -> vector<16x8xf32>
    %c0_26 = arith.constant 0 : index
    %c0_27 = arith.constant 0 : index
    %27 = vector.load %arg10[%c0_26, %c0_27] : memref<8x8xf32, #tpu.memory_space<vmem>>, vector<8x8xf32>
    %cst_28 = arith.constant dense<0.000000e+00> : vector<16x8xf32>
    %28 = tpu.matmul %23, %27, %cst_28 {dimension_numbers = #tpu.dot_dimension_numbers<[1], [0], [0], [1], [0, 0, 1, 1], [], []>} : vector<16x8xf32>, vector<8x8xf32>, vector<16x8xf32> -> vector<16x8xf32>
    %29 = arith.addf %26, %28 : vector<16x8xf32>
    %c0_29 = arith.constant 0 : index
    %c0_30 = arith.constant 0 : index
    %30 = vector.load %arg11[%c0_29, %c0_30] : memref<1x8xf32, #tpu.memory_space<vmem>>, vector<1x8xf32>
    %31 = vector.broadcast %30 : vector<1x8xf32> to vector<16x8xf32>
    %32 = arith.addf %29, %31 : vector<16x8xf32>
    %cst_31 = arith.constant 0.000000e+00 : f32
    %33 = vector.broadcast %cst_31 : f32 to vector<16x8xf32>
    %34 = arith.maximumf %32, %33 : vector<16x8xf32>
    %c0_32 = arith.constant 0 : index
    %c0_33 = arith.constant 0 : index
    %35 = vector.load %arg2[%c0_32, %c0_33] : memref<2x16xf32, #tpu.memory_space<vmem>>, vector<2x16xf32>
    %cst_34 = arith.constant dense<0.000000e+00> : vector<2x8xf32>
    %36 = tpu.matmul %35, %34, %cst_34 {dimension_numbers = #tpu.dot_dimension_numbers<[1], [0], [0], [1], [0, 0, 1, 1], [], []>} : vector<2x16xf32>, vector<16x8xf32>, vector<2x8xf32> -> vector<2x8xf32>
    %c0_35 = arith.constant 0 : index
    %c0_36 = arith.constant 0 : index
    %37 = vector.load %arg12[%c0_35, %c0_36] : memref<8x3xf32, #tpu.memory_space<vmem>>, vector<8x3xf32>
    %cst_37 = arith.constant dense<0.000000e+00> : vector<2x3xf32>
    %38 = tpu.matmul %36, %37, %cst_37 {dimension_numbers = #tpu.dot_dimension_numbers<[1], [0], [0], [1], [0, 0, 1, 1], [], []>} : vector<2x8xf32>, vector<8x3xf32>, vector<2x3xf32> -> vector<2x3xf32>
    %c0_38 = arith.constant 0 : index
    %c0_39 = arith.constant 0 : index
    %39 = vector.load %arg13[%c0_38, %c0_39] : memref<1x3xf32, #tpu.memory_space<vmem>>, vector<1x3xf32>
    %40 = vector.broadcast %39 : vector<1x3xf32> to vector<2x3xf32>
    %41 = arith.addf %38, %40 : vector<2x3xf32>
    %c0_40 = arith.constant 0 : index
    %c0_41 = arith.constant 0 : index
    %42 = vector.load %arg14[%c0_40, %c0_41] : memref<2x3xf32, #tpu.memory_space<vmem>>, vector<2x3xf32>
    tpu.vector_store %arg14[%c0_40, %c0_41], %41 {strides = array<i32>} : memref<2x3xf32, #tpu.memory_space<vmem>>, vector<2x3xf32>,
    return
  }
}

</mosaic_0001>

<bundles_post_ra>
// kernel: tpu_custom_call.1
= control target key start
LH: loop header
LB: loop body
LE: loop exit
PB: predicated region body
PF: predicated region fallthrough
CT: control target
= control target key end

     0   :  { %19 = vsyncpa [#allocation3], 0  ;;  %s815_s0 = inlined_call_operand.vmem [shape: f32[16,4], index: 0, kind: input, shape index: {}]   ;;  %s816_s1 = inlined_call_operand.vmem [shape: f32[16,16], index: 1, kind: input, shape index: {}]   ;;  %s817_s2 = inlined_call_operand.hbm [shape: f32[2,16], index: 2, kind: input, shape index: {}]   ;;  %s818_s3 = inlined_call_operand.vmem [shape: f32[4,8], index: 3, kind: input, shape index: {}]   ;;  %s819_s4 = inlined_call_operand.hbm [shape: f32[4,8], index: 4, kind: input, shape index: {}]   ;;  %s820_s5 = inlined_call_operand.vmem [shape: f32[1,8], index: 5, kind: input, shape index: {}]   ;;  %s821_s6 = inlined_call_operand.vmem [shape: f32[8,8], index: 6, kind: input, shape index: {}]   ;;  %s822_s7 = inlined_call_operand.hbm [shape: f32[8,8], index: 7, kind: input, shape index: {}]   ;;  %s823_s8 = inlined_call_operand.vmem [shape: f32[1,8], index: 8, kind: input, shape index: {}]   ;;  %s824_s9 = inlined_call_operand.hbm [shape: f32[8,8], index: 9, kind: input, shape index: {}]   ;;  %s825_s10 = inlined_call_operand.hbm [shape: f32[8,8], index: 10, kind: input, shape index: {}]   ;;  %s826_s11 = inlined_call_operand.vmem [shape: f32[1,8], index: 11, kind: input, shape index: {}]   ;;  %s827_s12 = inlined_call_operand.vmem [shape: f32[8,3], index: 12, kind: input, shape index: {}]   ;;  %s828_s13 = inlined_call_operand.vmem [shape: f32[1,3], index: 13, kind: input, shape index: {}]   ;;  %s829_s14 = inlined_call_operand.hbm [shape: f32[2,3], index: 14, kind: output, shape index: {}]  }
   0x1   :  { %20 = vsyncpa [#allocation6], 0 }
   0x2   :  { %21 = vsyncpa [#allocation9], 0  ;;  %s45_s15 = sshll.u32 %s819_s4, 4  ;;  %s46_s15 = int_to_ptr.hbm [resolvable:$true] %s45_s15 }
   0x3   :  { %22 = vsyncpa [#allocation4], 0  ;;  %s667_s16 = smov [#allocation5]   ;;  %s73_s20 = sshll.u32 %s824_s9, 4  ;;  %s74_s20 = int_to_ptr.hbm [resolvable:$true] %s73_s20 }
   0x4   :  { %s47_s17 = sshll.u32 %s667_s16, 4  ;;  %s668_s21 = smov [#allocation8]   ;;  %s48_s17 = int_to_ptr.vmem [resolvable:$true] %s47_s17 }
   0x5   :  { %50 = dma.hbm_to_vmem [thread:$0]  %s46_s15, 64, %s48_s17, [#allocation6]  }
   0x6   :  { %s75_s22 = sshll.u32 %s668_s21, 4  ;;  %s32_s25 = sshll.u32 %s817_s2, 4  ;;  %s76_s22 = int_to_ptr.vmem [resolvable:$true] %s75_s22  ;;  %s33_s25 = int_to_ptr.hbm [resolvable:$true] %s32_s25 }
   0x7   :  { %78 = dma.hbm_to_vmem [thread:$0]  %s74_s20, 128, %s76_s22, [#allocation9]  }
   0x8   :  { %s60_s27 = sshll.u32 %s822_s7, 4  ;;  %s669_s28 = smov [#allocation2]   ;;  %s61_s27 = int_to_ptr.hbm [resolvable:$true] %s60_s27 }
   0x9   :  { %s34_s29 = sshll.u32 %s669_s28, 4  ;;  %s670_s9 = smov [#allocation7]   ;;  %s35_s29 = int_to_ptr.vmem [resolvable:$true] %s34_s29 }
   0xa   :  { %37 = dma.hbm_to_vmem [thread:$0]  %s33_s25, 32, %s35_s29, [#allocation3]  }
   0xb   :  { %s62_s30 = sshll.u32 %s670_s9, 4  ;;  %s84_s17 = sshll.u32 %s825_s10, 4  ;;  %s63_s30 = int_to_ptr.vmem [resolvable:$true] %s62_s30  ;;  %s85_s17 = int_to_ptr.hbm [resolvable:$true] %s84_s17 }
   0xc   :  { %65 = dma.hbm_to_vmem [thread:$0]  %s61_s27, 128, %s63_s30, [#allocation6]  }
   0xd   :  { %s671_s2 = smov [#allocation10]  }
   0xe   :  { %s86_s18 = sshll.u32 %s671_s2, 4  ;;  %s87_s18 = int_to_ptr.vmem [resolvable:$true] %s86_s18 }
   0xf   :  { %89 = dma.hbm_to_vmem [thread:$0]  %s85_s17, 128, %s87_s18, [#allocation9]  }
  0x10   :  { %659 = dma.done.wait [#allocation3], 32  }
  0x11   :  { %660 = vsyncadd [#allocation3], 4294967264 }
  0x12   :  { %661 = dma.done.wait [#allocation6], 192  }
  0x13   :  { %662 = vsyncadd [#allocation6], 4294967104 }
  0x14   :  { %663 = dma.done.wait [#allocation9], 256  }
  0x15   :  { %664 = vsyncadd [#allocation9], 4294967040  ;;  %v117_v0 = vld [vmem:[%s815_s0 + $0x8] sm:$0xff]  ;;  %v116_v1 = vld [vmem:[%s815_s0] sm:$0xff]  ;;  %vm120_vm0 = vcmask 130048   ;;  %vm159_vm1 = vcmask 1043456  }
  0x16   :  { %141 = vmatpush.msra.mxu0 %v117_v0  ;;  %v118_v2 = vld [vmem:[%s816_s1] sm:$0xff]  ;;  %v119_v3 = vld [vmem:[%s816_s1 + $0x8] sm:$0xff]  ;;  %vm152_vm2 = vcmask 31744   ;;  %vm251_vm3 = vcmask 64512   ;;  %v342_v23 = vld [vmem:[#allocation10] sm:$0xff]  ;;  %s470_s17 = sshll.u32 %s829_s14, 4  ;;  %s471_s17 = int_to_ptr.hbm [resolvable:$true] %s470_s17 }
  0x17   :  { %v150_v4 = vld [vmem:[%s818_s3] sm:$0xf]  ;;  %v250_v8 = vld [vmem:[#allocation7] sm:$0xff]  ;;  %v341_v35 = vld [vmem:[#allocation8] sm:$0xff]  ;;  %vm461_vm4 = vcmask 17408  }
  0x18   :  { %142 = vmatpush.msra.mxu0 %v116_v1  ;;  %487 = vmatpush.msk.msra.mxu2 %vm159_vm1, %v150_v4  ;;  %v151_v5 = vld [vmem:[#allocation5] sm:$0xf]  ;;  %v511_v10 = vld [vmem:[%s820_s5] ss:$0 sm:$0xff] }
  0x19   :  { %482 = vmatmul.msk.f32.vlgmr.msra.gmra.mxu0 %vm120_vm0, %v118_v2  ;;  %484 = vmatpush.msk.msra.mxu1 %vm159_vm1, %v151_v5  ;;  %v249_v20 = vld [vmem:[%s821_s6] sm:$0xff] }
  0x1a   :  { %504 = vmatpush.msk.msra.mxu3 %vm159_vm1, %v151_v5  ;;  %485 = vmatmul.msk.f32.vlgmr.msra.gmra.mxu1 %vm152_vm2, %v116_v1  ;;  %v512_v25 = vld [vmem:[%s823_s8] ss:$0 sm:$0xff] }
  0x1b   :  { %486 = vmatmul.msk.f32.vlgmr.msra.gmra.mxu3 %vm152_vm2, %v117_v0  ;;  %273 = vmatpush.msrb.mxu1 %v250_v8  ;;  %v433_v38 = vld [vmem:[%s827_s12] sm:$0xff] }
  0x1c   :  { %302 = vmatpush.msrb.mxu2 %v249_v20  ;;  %v513_v42 = vld [vmem:[%s826_s11] ss:$0 sm:$0xff]  ;;  %s672_s11 = smov [#allocation11]  }
  0x1d   :  { %393 = vmatpush.msra.mxu1 %v341_v35  ;;  %v409_v50 = vld [vmem:[#allocation2] sm:$0x3]  ;;  %s468_s30 = sshll.u32 %s672_s11, 4  ;;  %s469_s30 = int_to_ptr.vmem [resolvable:$true] %s468_s30 }
  0x1e   :  { %v514_v52 = vld [vmem:[%s828_s13] ss:$0 sm:$0xff] }
  0x21   :  { %483 = vmatmul.msk.f32.gmra.mxu0 %vm120_vm0, %v119_v3 }
  0x96   :  { %v144_v6 = vpop.f32.mrf.mxu0 }
  0x97   :  { %488 = vmatmul.msk.f32.vlgmr.msra.gmra.mxu2 %vm152_vm2, %v144_v6  ;;  %v180_v9 = vpop.f32.mrf.mxu1 }
  0x9e   :  { %v147_v7 = vpop.f32.mrf.mxu0  ;;  %v183_v15 = vpop.f32.mrf.mxu3 }
  0x9f   :  { %489 = vmatmul.msk.f32.gmra.mxu2 %vm152_vm2, %v147_v7 }
 0x11a   :  { %v212_v11 = vpop.f32.mrf.mxu2 }
 0x11b   :  { %v213_v12 = vadd.f32 %v212_v11, %v180_v9 }
 0x11d   :  { %v222_v13 = vadd.f32 %v511_v10, %v213_v12 }
 0x11f   :  { %v224_v14 = vmax.f32 %v222_v13, 0.0 }
 0x121   :  { %492 = vmatmul.msk.f32.vlgmr.msrb.gmra.mxu1 %vm251_vm3, %v224_v14 }
 0x122   :  { %v215_v16 = vpop.f32.mrf.mxu2 }
 0x123   :  { %v216_v17 = vadd.f32 %v215_v16, %v183_v15 }
 0x125   :  { %v223_v18 = vadd.f32 %v511_v10, %v216_v17 }
 0x127   :  { %v225_v19 = vmax.f32 %v223_v18, 0.0 }
 0x129   :  { %240 = vmatpush.msrb.mxu3 %v225_v19  ;;  %493 = vmatmul.msk.f32.gmra.mxu1 %vm251_vm3, %v225_v19 }
 0x12b   :  { %241 = vmatpush.msrb.mxu3 %v224_v14 }
 0x12c   :  { %490 = vmatmul.msk.f32.vlgmr.msrb.gmra.mxu3 %vm120_vm0, %v118_v2 }
 0x12d   :  { %364 = vmatpush.msra.mxu3 %v342_v23 }
 0x134   :  { %491 = vmatmul.msk.f32.gmra.mxu3 %vm120_vm0, %v119_v3 }
 0x19e   :  { %v275_v24 = vpop.f32.mrf.mxu1 }
 0x1a6   :  { %v278_v30 = vpop.f32.mrf.mxu1 }
 0x1af   :  { %v243_v21 = vpop.f32.mrf.mxu3 }
 0x1b0   :  { %494 = vmatmul.msk.f32.vlgmr.msrb.gmra.mxu2 %vm251_vm3, %v243_v21 }
 0x1b7   :  { %v246_v22 = vpop.f32.mrf.mxu3 }
 0x1b8   :  { %495 = vmatmul.msk.f32.gmra.mxu2 %vm251_vm3, %v246_v22 }
 0x233   :  { %v304_v26 = vpop.f32.mrf.mxu2 }
 0x234   :  { %v305_v27 = vadd.f32 %v304_v26, %v275_v24 }
 0x236   :  { %v314_v28 = vadd.f32 %v512_v25, %v305_v27 }
 0x238   :  { %v316_v29 = vmax.f32 %v314_v28, 0.0 }
 0x23a   :  { %498 = vmatmul.msk.f32.vlgmr.msra.gmra.mxu3 %vm251_vm3, %v316_v29 }
 0x23b   :  { %v307_v31 = vpop.f32.mrf.mxu2 }
 0x23c   :  { %v308_v32 = vadd.f32 %v307_v31, %v278_v30 }
 0x23e   :  { %v315_v33 = vadd.f32 %v512_v25, %v308_v32 }
 0x240   :  { %v317_v34 = vmax.f32 %v315_v33, 0.0 }
 0x242   :  { %332 = vmatpush.msrb.mxu0 %v317_v34  ;;  %499 = vmatmul.msk.f32.gmra.mxu3 %vm251_vm3, %v317_v34 }
 0x244   :  { %333 = vmatpush.msrb.mxu0 %v316_v29 }
 0x245   :  { %496 = vmatmul.msk.f32.vlgmr.msrb.gmra.mxu0 %vm120_vm0, %v118_v2 }
 0x246   :  { %456 = vmatpush.msra.mxu0 %v433_v38 }
 0x24d   :  { %497 = vmatmul.msk.f32.gmra.mxu0 %vm120_vm0, %v119_v3 }
 0x2bd   :  { %v366_v39 = vpop.f32.mrf.mxu3 }
 0x2c2   :  { %v335_v36 = vpop.f32.mrf.mxu0 }
 0x2c3   :  { %500 = vmatmul.msk.f32.vlgmr.msra.gmra.mxu1 %vm251_vm3, %v335_v36 }
 0x2c5   :  { %v369_v43 = vpop.f32.mrf.mxu3 }
 0x2ca   :  { %v338_v37 = vpop.f32.mrf.mxu0 }
 0x2cb   :  { %501 = vmatmul.msk.f32.gmra.mxu1 %vm251_vm3, %v338_v37 }
 0x340   :  { %v395_v40 = vpop.f32.mrf.mxu1 }
 0x341   :  { %v396_v41 = vadd.f32 %v395_v40, %v366_v39 }
 0x343   :  { %v405_v46 = vadd.f32 %v513_v42, %v396_v41 }
 0x345   :  { %v407_v49 = vmax.f32 %v405_v46, 0.0 }
 0x348   :  { %v398_v44 = vpop.f32.mrf.mxu1 }
 0x349   :  { %v399_v45 = vadd.f32 %v398_v44, %v369_v43 }
 0x34b   :  { %v406_v47 = vadd.f32 %v513_v42, %v399_v45 }
 0x34d   :  { %v408_v48 = vmax.f32 %v406_v47, 0.0 }
 0x34f   :  { %427 = vmatpush.msra.mxu2 %v408_v48 }
 0x351   :  { %428 = vmatpush.msra.mxu2 %v407_v49 }
 0x352   :  { %502 = vmatmul.msk.f32.vlgmr.msra.gmra.mxu2 %vm120_vm0, %v409_v50 }
 0x3d5   :  { %v430_v51 = vpop.f32.mrf.mxu2 }
 0x3d6   :  { %503 = vmatmul.msk.f32.vlgmr.msra.gmra.mxu0 %vm251_vm3, %v430_v51 }
 0x453   :  { %v458_v53 = vpop.f32.mrf.mxu0 }
 0x454   :  { %v459_v54 = vadd.f32 %v514_v52, %v458_v53 }
 0x456   :  { %462 = vst.msk [vmem:[#allocation11] sm:$0x3] %vm461_vm4, %v459_v54 }
 0x457   :  { %473 = dma.vmem_to_hbm [thread:$0]  %s469_s30, 32, %s471_s17, [#allocation4]  }
 0x458   :  { %665 = dma.done.wait [#allocation4], 32  }
 0x459   :  { %666 = vsyncadd [#allocation4], 4294967264 }
 0x45a   :  { %478 = vsyncpa [#allocation3], 1 }
 0x45b   :  { %479 = vsyncpa [#allocation6], 1 }
 0x45c   :  { %480 = vsyncpa [#allocation9], 1 }
 0x45d   :  { %481 = vsyncpa [#allocation4], 1 }

</bundles_post_ra>
